<compile_context>
chip_gen: v5e
topology: v5e:2x2
jax: 0.10.0
libtpu: 0.0.40
codegen_flags: <defaults>
</compile_context>

<pallas_src>
import math

import jax
import jax.numpy as jnp
from jax.experimental import pallas as pl
from jax.experimental.pallas import tpu as pltpu

HIDDEN = 128


def _round_up(x: int, m: int) -> int:
    return ((x + m - 1) // m) * m


def _critic_kernel(x_ref, w1_ref, b1_ref, w2_ref, b2_ref, w3_ref, b3_ref, o_ref):
    # x arrives f32; cast to bf16 in-kernel (VPU work, hidden under MXU shadow).
    x = x_ref[...].astype(jnp.bfloat16)
    # Layer 1: Linear + ReLU (bf16 MXU matmul, f32 accumulate, f32 elementwise).
    h1 = jnp.dot(x, w1_ref[...], preferred_element_type=jnp.float32)
    h1 = jnp.maximum(h1 + b1_ref[...], 0.0)
    # Layer 2: Linear + ReLU (dominant 128x128 GEMM; feed the MXU bf16).
    h2 = jnp.dot(h1.astype(jnp.bfloat16), w2_ref[...],
                 preferred_element_type=jnp.float32)
    h2 = jnp.maximum(h2 + b2_ref[...], 0.0)
    # Value head (out_features = 1): VPU multiply + lane reduce instead of an
    # N=1 MXU matmul; b3 is a scalar in SMEM.
    v = jnp.sum(h2 * w3_ref[...], axis=-1, keepdims=True) + b3_ref[0, 0]
    o_ref[...] = v.astype(o_ref.dtype)


def _choose_batch_tile(B: int, block_m: int) -> int:
    # Aim for >= 2 grid steps so both v7x TensorCores get work (no-op on v5e/v6e),
    # round to a multiple of 128 rows, cap at block_m.
    tm = min(block_m, _round_up(pl.cdiv(B, 2), 128))
    if tm >= B:
        tm = B  # single block covering the whole batch exactly (no partial block)
    return tm


def critic_forward(x, params, *, block_m: int = 4096):
    """x: [B, num_obs] float32 -> [B, 1] float32."""
    w1, b1, w2, b2, w3, b3 = params
    B, num_obs = x.shape
    H = w1.shape[1]

    tm = _choose_batch_tile(B, block_m)
    grid = (pl.cdiv(B, tm),)  # partial last block is masked by Pallas; no padding.

    # Weights are tiny (~100 KiB): pre-cast once in the wrapper. x stays f32 and is
    # cast to bf16 inside the kernel.
    w1_bf16 = w1.astype(jnp.bfloat16)
    w2_bf16 = w2.astype(jnp.bfloat16)
    w3_row = w3.reshape(1, H).astype(jnp.float32)   # value-head weights as a lane row
    b3_s = b3.reshape(1, 1).astype(jnp.float32)     # scalar bias -> SMEM

    flops = 2 * B * (num_obs * H + H * H + H)
    bytes_accessed = (
        B * num_obs * 4                          # x (f32; cast to bf16 in-kernel)
        + (num_obs * H + H * H) * 2 + H * 4      # w1, w2 (bf16), w3 row (f32)
        + 2 * H * 4 + 4                          # b1, b2, b3
        + B * 4                                  # output
    )

    return pl.pallas_call(
        _critic_kernel,
        out_shape=jax.ShapeDtypeStruct((B, 1), jnp.float32),
        grid=grid,
        in_specs=[
            pl.BlockSpec((tm, num_obs), lambda i: (i, 0)),      # x tile (pipelined)
            pl.BlockSpec((num_obs, H), lambda i: (0, 0)),       # w1 (VMEM-resident)
            pl.BlockSpec((1, H), lambda i: (0, 0)),             # b1 (resident)
            pl.BlockSpec((H, H), lambda i: (0, 0)),             # w2 (resident)
            pl.BlockSpec((1, H), lambda i: (0, 0)),             # b2 (resident)
            pl.BlockSpec((1, H), lambda i: (0, 0)),             # w3 row (resident)
            pl.BlockSpec(memory_space=pltpu.MemorySpace.SMEM),  # b3 scalar
        ],
        out_specs=pl.BlockSpec((tm, 1), lambda i: (i, 0)),
        compiler_params=pltpu.CompilerParams(
            dimension_semantics=("parallel",),
        ),
        cost_estimate=pl.CostEstimate(
            flops=flops, transcendentals=0, bytes_accessed=bytes_accessed
        ),
    )(x, w1_bf16, b1, w2_bf16, b2, w3_row, b3_s)


def _xavier_uniform(key, fan_in, fan_out):
    # Matches nn.init.xavier_uniform_: U(-a, a), a = sqrt(6 / (fan_in + fan_out)).
    # Stored as [in, out] (transpose of PyTorch's [out, in]); distribution is symmetric.
    bound = math.sqrt(6.0 / (fan_in + fan_out))
    return jax.random.uniform(
        key, (fan_in, fan_out), dtype=jnp.float32, minval=-bound, maxval=bound
    )


def init_critic_params(key, num_obs, hidden=HIDDEN):
    k1, k2, k3 = jax.random.split(key, 3)
    w1 = _xavier_uniform(k1, num_obs, hidden)
    b1 = jnp.zeros((1, hidden), jnp.float32)
    w2 = _xavier_uniform(k2, hidden, hidden)
    b2 = jnp.zeros((1, hidden), jnp.float32)
    w3 = _xavier_uniform(k3, hidden, 1)
    b3 = jnp.zeros((1, 1), jnp.float32)
    return (w1, b1, w2, b2, w3, b3)


def _reference_forward_bf16(x, params):
    # Pure-JAX reference mirroring the kernel's bf16-input / f32-accumulate matmuls.
    w1, b1, w2, b2, w3, b3 = params
    h1 = jnp.dot(x.astype(jnp.bfloat16), w1.astype(jnp.bfloat16),
                 preferred_element_type=jnp.float32)
    h1 = jnp.maximum(h1 + b1, 0.0)
    h2 = jnp.dot(h1.astype(jnp.bfloat16), w2.astype(jnp.bfloat16),
                 preferred_element_type=jnp.float32)
    h2 = jnp.maximum(h2 + b2, 0.0)
    return h2 @ w3 + b3


def _reference_forward_f32(x, params):
    # True f32 reference (what the PyTorch module computes).
    w1, b1, w2, b2, w3, b3 = params
    h1 = jnp.maximum(x @ w1 + b1, 0.0)
    h2 = jnp.maximum(h1 @ w2 + b2, 0.0)
    return h2 @ w3 + b3


def _check(x, params):
    out = jax.block_until_ready(critic_forward(x, params))
    assert out.shape == (x.shape[0], 1), out.shape
    ref = _reference_forward_bf16(x, params)
    assert jnp.allclose(out, ref, atol=1e-4, rtol=1e-4), (
        float(jnp.max(jnp.abs(out - ref)))
    )
    ref32 = _reference_forward_f32(x, params)
    assert jnp.allclose(out, ref32, atol=5e-2, rtol=5e-2), (
        float(jnp.max(jnp.abs(out - ref32)))
    )
    return out


if __name__ == "__main__":
    key = jax.random.PRNGKey(0)
    k_param, k_x1, k_x2 = jax.random.split(key, 3)

    num_obs = 16
    params = init_critic_params(k_param, num_obs)

    # Small batch: single exact block (tm = B), grid = (1,).
    x_small = jax.random.normal(k_x1, (8, num_obs), dtype=jnp.float32)
    _check(x_small, params)

    # Larger batch: multi-step grid with a masked partial last block
    # (tm = 256, grid = (2,), rows 256..299 in the second block).
    x_big = jax.random.normal(k_x2, (300, num_obs), dtype=jnp.float32)
    _check(x_big, params)

    print("KERNEL_OK")
</pallas_src>

<mosaic_0001>
module attributes {stable_mosaic.version = 11 : i64} {
  func.func @_critic_kernel(%arg0: i32, %arg1: memref<8x16xf32, #tpu.memory_space<vmem>>, %arg2: memref<16x128xbf16, #tpu.memory_space<vmem>>, %arg3: memref<1x128xf32, #tpu.memory_space<vmem>>, %arg4: memref<128x128xbf16, #tpu.memory_space<vmem>>, %arg5: memref<1x128xf32, #tpu.memory_space<vmem>>, %arg6: memref<1x128xf32, #tpu.memory_space<vmem>>, %arg7: memref<1x1xf32, #tpu.memory_space<smem>>, %arg8: memref<8x1xf32, #tpu.memory_space<vmem>>) attributes {dimension_semantics = [#tpu.dimension_semantics<parallel>], iteration_bounds = array<i64: 1>, scalar_prefetch = 0 : i64, scratch_operands = 0 : i64, tpu.core_type = #tpu.core_type<tc>, window_params = [{transform_indices = @transform_0, window_bounds = array<i64: 8, 16>}, {pipeline_mode = #tpu.pipeline_mode<synchronous>, transform_indices = @transform_1, window_bounds = array<i64: 16, 128>}, {pipeline_mode = #tpu.pipeline_mode<synchronous>, transform_indices = @transform_2, window_bounds = array<i64: 1, 128>}, {pipeline_mode = #tpu.pipeline_mode<synchronous>, transform_indices = @transform_3, window_bounds = array<i64: 128, 128>}, {pipeline_mode = #tpu.pipeline_mode<synchronous>, transform_indices = @transform_4, window_bounds = array<i64: 1, 128>}, {pipeline_mode = #tpu.pipeline_mode<synchronous>, transform_indices = @transform_5, window_bounds = array<i64: 1, 128>}, {transform_indices = @transform_6, window_bounds = array<i64: 1, 1>}, {transform_indices = @transform_7, window_bounds = array<i64: 8, 1>}]} {
    %c0 = arith.constant 0 : index
    %c0_0 = arith.constant 0 : index
    %0 = vector.load %arg1[%c0, %c0_0] : memref<8x16xf32, #tpu.memory_space<vmem>>, vector<8x16xf32>
    %1 = arith.truncf %0 : vector<8x16xf32> to vector<8x16xbf16>
    %c0_1 = arith.constant 0 : index
    %c0_2 = arith.constant 0 : index
    %2 = vector.load %arg2[%c0_1, %c0_2] : memref<16x128xbf16, #tpu.memory_space<vmem>>, vector<16x128xbf16>
    %cst = arith.constant dense<0.000000e+00> : vector<8x128xf32>
    %3 = tpu.matmul %1, %2, %cst {dimension_numbers = #tpu.dot_dimension_numbers<[1], [0], [0], [1], [0, 0, 1, 1], [], []>} : vector<8x16xbf16>, vector<16x128xbf16>, vector<8x128xf32> -> vector<8x128xf32>
    %c0_3 = arith.constant 0 : index
    %c0_4 = arith.constant 0 : index
    %4 = vector.load %arg3[%c0_3, %c0_4] : memref<1x128xf32, #tpu.memory_space<vmem>>, vector<1x128xf32>
    %5 = vector.broadcast %4 : vector<1x128xf32> to vector<8x128xf32>
    %6 = arith.addf %3, %5 : vector<8x128xf32>
    %cst_5 = arith.constant 0.000000e+00 : f32
    %7 = vector.broadcast %cst_5 : f32 to vector<8x128xf32>
    %8 = arith.maximumf %6, %7 : vector<8x128xf32>
    %9 = arith.truncf %8 : vector<8x128xf32> to vector<8x128xbf16>
    %c0_6 = arith.constant 0 : index
    %c0_7 = arith.constant 0 : index
    %10 = vector.load %arg4[%c0_6, %c0_7] : memref<128x128xbf16, #tpu.memory_space<vmem>>, vector<128x128xbf16>
    %cst_8 = arith.constant dense<0.000000e+00> : vector<8x128xf32>
    %11 = tpu.matmul %9, %10, %cst_8 {dimension_numbers = #tpu.dot_dimension_numbers<[1], [0], [0], [1], [0, 0, 1, 1], [], []>} : vector<8x128xbf16>, vector<128x128xbf16>, vector<8x128xf32> -> vector<8x128xf32>
    %c0_9 = arith.constant 0 : index
    %c0_10 = arith.constant 0 : index
    %12 = vector.load %arg5[%c0_9, %c0_10] : memref<1x128xf32, #tpu.memory_space<vmem>>, vector<1x128xf32>
    %13 = vector.broadcast %12 : vector<1x128xf32> to vector<8x128xf32>
    %14 = arith.addf %11, %13 : vector<8x128xf32>
    %cst_11 = arith.constant 0.000000e+00 : f32
    %15 = vector.broadcast %cst_11 : f32 to vector<8x128xf32>
    %16 = arith.maximumf %14, %15 : vector<8x128xf32>
    %c0_12 = arith.constant 0 : index
    %c0_13 = arith.constant 0 : index
    %17 = vector.load %arg6[%c0_12, %c0_13] : memref<1x128xf32, #tpu.memory_space<vmem>>, vector<1x128xf32>
    %18 = vector.broadcast %17 : vector<1x128xf32> to vector<8x128xf32>
    %19 = arith.mulf %16, %18 : vector<8x128xf32>
    %cst_14 = arith.constant dense<0.000000e+00> : vector<8xf32>
    %20 = vector.multi_reduction <add>, %19, %cst_14 [1] : vector<8x128xf32> to vector<8xf32>
    %21 = vector.shape_cast %20 : vector<8xf32> to vector<8x1xf32>
    %c0_15 = arith.constant 0 : index
    %c0_16 = arith.constant 0 : index
    %22 = memref.load %arg7[%c0_15, %c0_16] : memref<1x1xf32, #tpu.memory_space<smem>>
    %23 = vector.broadcast %22 : f32 to vector<8x1xf32>
    %24 = arith.addf %21, %23 : vector<8x1xf32>
    %c0_17 = arith.constant 0 : index
    %c0_18 = arith.constant 0 : index
    %25 = vector.load %arg8[%c0_17, %c0_18] : memref<8x1xf32, #tpu.memory_space<vmem>>, vector<8x1xf32>
    tpu.vector_store %arg8[%c0_17, %c0_18], %24 {strides = array<i32>} : memref<8x1xf32, #tpu.memory_space<vmem>>, vector<8x1xf32>,
    return
  }
  func.func @transform_0(%arg0: i32) -> (i32, i32) {
    %c0_i32 = arith.constant 0 : i32
    %c0_i32_0 = arith.constant 0 : i32
    return %arg0, %c0_i32 : i32, i32
  }
  func.func @transform_1(%arg0: i32) -> (i32, i32) {
    %c0_i32 = arith.constant 0 : i32
    %c0_i32_0 = arith.constant 0 : i32
    %c0_i32_1 = arith.constant 0 : i32
    return %c0_i32, %c0_i32_0 : i32, i32
  }
  func.func @transform_2(%arg0: i32) -> (i32, i32) {
    %c0_i32 = arith.constant 0 : i32
    %c0_i32_0 = arith.constant 0 : i32
    %c0_i32_1 = arith.constant 0 : i32
    return %c0_i32, %c0_i32_0 : i32, i32
  }
  func.func @transform_3(%arg0: i32) -> (i32, i32) {
    %c0_i32 = arith.constant 0 : i32
    %c0_i32_0 = arith.constant 0 : i32
    %c0_i32_1 = arith.constant 0 : i32
    return %c0_i32, %c0_i32_0 : i32, i32
  }
  func.func @transform_4(%arg0: i32) -> (i32, i32) {
    %c0_i32 = arith.constant 0 : i32
    %c0_i32_0 = arith.constant 0 : i32
    %c0_i32_1 = arith.constant 0 : i32
    return %c0_i32, %c0_i32_0 : i32, i32
  }
  func.func @transform_5(%arg0: i32) -> (i32, i32) {
    %c0_i32 = arith.constant 0 : i32
    %c0_i32_0 = arith.constant 0 : i32
    %c0_i32_1 = arith.constant 0 : i32
    return %c0_i32, %c0_i32_0 : i32, i32
  }
  func.func @transform_6(%arg0: i32) -> (i32, i32) {
    %c0_i32 = arith.constant 0 : i32
    %c0_i32_0 = arith.constant 0 : i32
    %c0_i32_1 = arith.constant 0 : i32
    return %c0_i32, %c0_i32_0 : i32, i32
  }
  func.func @transform_7(%arg0: i32) -> (i32, i32) {
    %c0_i32 = arith.constant 0 : i32
    %c0_i32_0 = arith.constant 0 : i32
    return %arg0, %c0_i32 : i32, i32
  }
}

</mosaic_0001>

<bundles_post_ra>
// kernel: tpu_custom_call.1
= control target key start
LH: loop header
LB: loop body
LE: loop exit
PB: predicated region body
PF: predicated region fallthrough
CT: control target
= control target key end

     0   :  { %13 = vsyncpa [#allocation4], 0  ;;  %s405_s0 = inlined_call_operand.hbm [shape: f32[8,16], index: 0, kind: input, shape index: {}]   ;;  %s406_s1 = inlined_call_operand.hbm [shape: bf16[16,128], index: 1, kind: input, shape index: {}]   ;;  %s407_s2 = inlined_call_operand.vmem [shape: f32[1,128], index: 2, kind: input, shape index: {}]   ;;  %s408_s3 = inlined_call_operand.hbm [shape: bf16[128,128], index: 3, kind: input, shape index: {}]   ;;  %s409_s4 = inlined_call_operand.vmem [shape: f32[1,128], index: 4, kind: input, shape index: {}]   ;;  %s410_s5 = inlined_call_operand.vmem [shape: f32[1,128], index: 5, kind: input, shape index: {}]   ;;  %s411_s6 = inlined_call_operand.<no memory space> [shape: f32[1,1], index: 6, kind: input, shape index: {}]   ;;  %s412_s7 = inlined_call_operand.vmem [shape: f32[8,1], index: 7, kind: output, shape index: {}]  }
   0x1   :  { %14 = vsyncpa [#allocation6], 0  ;;  %s30_s26 = sshll.u32 %s406_s1, 4  ;;  %s336_s27 = smov [#allocation5]   ;;  %s31_s26 = int_to_ptr.hbm [resolvable:$true] %s30_s26 }
   0x2   :  { %s32_s28 = sshll.u32 %s336_s27, 4  ;;  %s20_s8 = sshll.u32 %s405_s0, 4  ;;  %s33_s28 = int_to_ptr.vmem [resolvable:$true] %s32_s28  ;;  %s21_s8 = int_to_ptr.hbm [resolvable:$true] %s20_s8 }
   0x3   :  { %s337_s9 = smov 64   ;;  %s338_s10 = smov 4  }
   0x4   :  { %38 = dma.hbm_to_vmem [thread:$0]  %s31_s26, 128, %s33_s28, [#allocation6], %s337_s9, %s337_s9, %s338_s10  }
   0x5   :  { %s339_s11 = smov [#allocation3]   ;;  %s45_s15 = sshll.u32 %s408_s3, 4  ;;  %s46_s15 = int_to_ptr.hbm [resolvable:$true] %s45_s15 }
   0x6   :  { %s22_s12 = sshll.u32 %s339_s11, 4  ;;  %s340_s1 = smov [#allocation7]   ;;  %s23_s12 = int_to_ptr.vmem [resolvable:$true] %s22_s12 }
   0x7   :  { %25 = dma.hbm_to_vmem [thread:$0]  %s21_s8, 128, %s23_s12, [#allocation4]  }
   0x8   :  { %s47_s16 = sshll.u32 %s340_s1, 4  ;;  %s48_s16 = int_to_ptr.vmem [resolvable:$true] %s47_s16 }
   0x9   :  { %53 = dma.hbm_to_vmem [thread:$0]  %s46_s15, 1024, %s48_s16, [#allocation6], %s337_s9, %s337_s9, %s338_s10  }
   0xa   :  { %332 = dma.done.wait [#allocation4], 128  }
   0xb   :  { %333 = vsyncadd [#allocation4], 4294967168 }
   0xc   :  { %334 = dma.done.wait [#allocation6], 1152  }
   0xd   :  { %335 = vsyncadd [#allocation6], 4294966144  ;;  %v243_v0 = vld [vmem:[#allocation5] sm:$0xff]  ;;  %v73_v1 = vld [vmem:[#allocation3] sm:$0xff]  ;;  %vm87_vm0 = vcmask 130048   ;;  %v196_v24 = vstv %s411_s6  ;;  %vm198_vm1 = vcmask 7168  }
   0xe   :  { %v251_v2 = vld [vmem:[#allocation7 + $0x38] sm:$0xff]  ;;  %v74_v3 = vpack.c.bf16 %v73_v1, %v73_v1  ;;  %98 = vmatpush.bf16.msra.mxu0 %v243_v0  ;;  %v250_v4 = vld [vmem:[#allocation7 + $0x30] sm:$0xff]  ;;  %v249_v5 = vld [vmem:[#allocation7 + $0x28] sm:$0xff] }
   0xf   :  { %174 = vmatpush.bf16.msra.mxu1 %v251_v2  ;;  %v248_v6 = vld [vmem:[#allocation7 + $0x20] sm:$0xff]  ;;  %v247_v7 = vld [vmem:[#allocation7 + $0x18] sm:$0xff]  ;;  %v246_v8 = vld [vmem:[#allocation7 + $0x10] sm:$0xff] }
  0x10   :  { %v245_v9 = vld [vmem:[#allocation7 + $0x8] sm:$0xff]  ;;  %v244_v10 = vld [vmem:[#allocation7] sm:$0xff]  ;;  %v257_v11 = vld [vmem:[%s407_s2] ss:$0 sm:$0xff] }
  0x11   :  { %210 = vmatmul.msk.bf16.vlgmr.msra.gmra.mxu0 %vm87_vm0, %v74_v3  ;;  %v258_v17 = vld [vmem:[%s409_s4] ss:$0 sm:$0xff] }
  0x12   :  { %v259_v20 = vld [vmem:[%s410_s5] ss:$0 sm:$0xff] }
  0x13   :  { %175 = vmatpush.bf16.msra.mxu1 %v250_v4 }
  0x17   :  { %176 = vmatpush.bf16.msra.mxu1 %v249_v5 }
  0x1b   :  { %177 = vmatpush.bf16.msra.mxu1 %v248_v6 }
  0x1f   :  { %178 = vmatpush.bf16.msra.mxu1 %v247_v7 }
  0x23   :  { %179 = vmatpush.bf16.msra.mxu1 %v246_v8 }
  0x27   :  { %180 = vmatpush.bf16.msra.mxu1 %v245_v9 }
  0x2b   :  { %181 = vmatpush.bf16.msra.mxu1 %v244_v10 }
  0x8e   :  { %v100_v12 = vpop.f32.mrf.mxu0 }
  0x8f   :  { %v101_v13 = vadd.f32 %v257_v11, %v100_v12 }
  0x91   :  { %v104_v14 = vmax.f32 %v101_v13, 0.0 }
  0x93   :  { %v105_v15 = vpack.c.bf16 %v104_v14, %v104_v14 }
  0x95   :  { %182 = vmatmul.bf16.vlgmr.msra.gmra.mxu1 %v105_v15 }
  0x96   :  { %v102_v16 = vpop.f32.mrf.mxu0 }
 0x112   :  { %v183_v18 = vpop.f32.mrf.mxu1 }
 0x113   :  { %v184_v19 = vadd.f32 %v258_v17, %v183_v18 }
 0x115   :  { %v187_v21 = vmax.f32 %v184_v19, 0.0 }
 0x117   :  { %v192_v22 = vmul.f32 %v259_v20, %v187_v21 }
 0x119   :  { %193 = vadd.xlane.f32.xlu0 %v192_v22 }
 0x11a   :  { %v185_v23 = vpop.f32.mrf.mxu1 }
 0x18c   :  { %v194_v25 = vpop.xlane.xlu0 %193 }
 0x18d   :  { %v197_v26 = vadd.f32 %v196_v24, %v194_v25 }
 0x18f   :  { %199 = vst.msk [vmem:[%s412_s7] sm:$0xff] %vm198_vm1, %v197_v26 }
 0x190   :  { %204 = vsyncpa [#allocation4], 1 }
 0x191   :  { %205 = vsyncpa [#allocation6], 1 }

</bundles_post_ra>
